<compile_context>
chip_gen: v6e
topology: v6e:2x2x1
jax: 0.10.0
libtpu: 0.0.40
codegen_flags: <defaults>
</compile_context>

<pallas_src>
import functools

import jax
import jax.numpy as jnp
from jax import lax
from jax.experimental import pallas as pl
from jax.experimental.pallas import tpu as pltpu


def _mamba_block_kernel(x_ref, w1_ref, w2_ref, vec_ref, o_ref):
    """One tile of tokens: full MLP + residual + LayerNorm, all in VMEM.

    vec_ref packs [b1; b2; gamma; beta] as a (4, D) f32 block.
    """
    x = x_ref[...]                                     # (tm, D), native dtype
    x_bf = x.astype(jnp.bfloat16)

    vecs = vec_ref[...]                                # (4, D) f32
    b1 = vecs[0:1]
    b2 = vecs[1:2]
    gamma = vecs[2:3]
    beta = vecs[3:4]

    # fc1 + ReLU  (bf16 MXU matmul, f32 accumulation)
    h = jnp.dot(x_bf, w1_ref[...], preferred_element_type=jnp.float32)
    h = jnp.maximum(h + b1, 0.0)

    # fc2  (bf16 MXU matmul, f32 accumulation)
    y = jnp.dot(h.astype(jnp.bfloat16), w2_ref[...],
                preferred_element_type=jnp.float32)
    y = y + b2

    # residual + LayerNorm over last dim in f32 (eps matches nn.LayerNorm 1e-5)
    r = x.astype(jnp.float32) + y
    mean = jnp.mean(r, axis=-1, keepdims=True)
    cen = r - mean
    var = jnp.mean(cen * cen, axis=-1, keepdims=True)
    out = cen * lax.rsqrt(var + 1e-5) * gamma + beta

    o_ref[...] = out.astype(o_ref.dtype)


def _tpu_vmem_policy():
    """(vmem_limit_bytes, tile_budget_bytes, num_tensorcores) for the local chip."""
    mib = 1024 * 1024
    cap = 128 * mib
    try:
        info = pltpu.get_tpu_info()
        cap = int(getattr(info, "vmem_capacity_bytes", cap)) or cap
    except Exception:
        pass
    kind = ""
    try:
        kind = jax.devices()[0].device_kind.lower()
    except Exception:
        pass
    # 2 TensorCores per chip on v7x-class parts (also hinted by 64 MiB VMEM/TC).
    num_tc = 2 if (cap <= 64 * mib or "v7" in kind or "7x" in kind) else 1
    # Headroom for compiler-internal scratch / semaphores / DMA descriptors.
    headroom = min(16 * mib, max(cap // 4, 4 * mib))
    vmem_limit = max(cap - headroom, 8 * mib)
    return vmem_limit, vmem_limit, num_tc


def _pick_tile(T, D, *, budget_bytes, num_tc):
    """Token-tile rows: largest VMEM/MXU-friendly tile (multiple of 128 if possible)."""
    weight_bytes = 2 * D * D * 2 + 8 * D * 4       # bf16 w1+w2 (single-buffered) + packed vec
    per_row = D * 4 * (2 * 2 + 3)                  # x/out tiles (double-buffered) + f32 temps
    avail = max(budget_bytes - weight_bytes, per_row * 16)
    cap = max(16, (avail // per_row) // 16 * 16)
    tm = min(512, cap)                             # ~512 rows is near HBM roofline already
    tm = (tm // 128) * 128 if tm >= 128 else (tm // 16) * 16
    t_pad = -(-T // 16) * 16
    tm = min(tm, t_pad)                            # never bigger than the (padded) input
    if num_tc >= 2:
        # 2-TC chips (v7x): aim for >= 2 grid steps per core so each core's
        # x/out DMA pipeline overlaps; don't shrink below 128 rows for it.
        while tm > 128 and -(-T // tm) < 2 * num_tc:
            tm //= 2
    return max(16, (tm // 16) * 16)


def prepare_params(w1, b1, w2, b2, gamma, beta):
    """One-time parameter prep (hoisted out of the per-call path):
    bf16 weight casts + packed (4, D) f32 [b1; b2; gamma; beta]."""
    D = w1.shape[0]
    w1_bf = jnp.asarray(w1, jnp.bfloat16)
    w2_bf = jnp.asarray(w2, jnp.bfloat16)
    vec = jnp.stack(
        [jnp.asarray(b1, jnp.float32),
         jnp.asarray(b2, jnp.float32),
         jnp.asarray(gamma, jnp.float32),
         jnp.asarray(beta, jnp.float32)], axis=0).reshape(4, D)
    return w1_bf, w2_bf, vec


@functools.partial(jax.jit,
                   static_argnames=("tm", "vmem_limit", "single_buffer_consts"))
def _mamba_block_2d(x2d, w1_bf, w2_bf, vec, *, tm, vmem_limit, single_buffer_consts):
    T, D = x2d.shape
    grid = pl.cdiv(T, tm)
    t_pad = grid * tm
    if t_pad != T:
        x2d = jnp.pad(x2d, ((0, t_pad - T), (0, 0)))

    # Constant-index blocks are DMA'd once; single-buffer them to save VMEM.
    const_kwargs = dict(pipeline_mode=pl.Buffered(1)) if single_buffer_consts else {}

    cost = pl.CostEstimate(
        flops=4 * T * D * D,                                   # two T x D x D matmuls
        transcendentals=T,                                     # one rsqrt per row
        bytes_accessed=2 * T * D * x2d.dtype.itemsize + 2 * D * D * 2 + 4 * D * 4,
    )

    out = pl.pallas_call(
        _mamba_block_kernel,
        out_shape=jax.ShapeDtypeStruct((t_pad, D), x2d.dtype),
        grid_spec=pltpu.PrefetchScalarGridSpec(
            num_scalar_prefetch=0,
            grid=(grid,),
            in_specs=[
                pl.BlockSpec((tm, D), lambda i: (i, 0)),                       # x tile
                pl.BlockSpec((D, D), lambda i: (0, 0), **const_kwargs),        # w1 (bf16)
                pl.BlockSpec((D, D), lambda i: (0, 0), **const_kwargs),        # w2 (bf16)
                pl.BlockSpec((4, D), lambda i: (0, 0), **const_kwargs),        # b1/b2/gamma/beta
            ],
            out_specs=pl.BlockSpec((tm, D), lambda i: (i, 0)),
        ),
        compiler_params=pltpu.CompilerParams(
            dimension_semantics=("parallel",),
            vmem_limit_bytes=int(vmem_limit),
        ),
        cost_estimate=cost,
    )(x2d, w1_bf, w2_bf, vec)

    if t_pad != T:
        out = out[:T]
    return out


def mamba_encoder_block(x, params, *, tm=None):
    """x: (B, S, D).  params = prepare_params(w1, b1, w2, b2, gamma, beta),
    with w1/w2 already transposed so y = x @ w + b."""
    w1_bf, w2_bf, vec = params
    B, S, D = x.shape
    T = B * S
    vmem_limit, tile_budget, num_tc = _tpu_vmem_policy()
    if tm is None:
        tm = _pick_tile(T, D, budget_bytes=tile_budget, num_tc=num_tc)
    x2d = x.reshape(T, D)
    try:
        out2d = _mamba_block_2d(x2d, w1_bf, w2_bf, vec, tm=tm,
                                vmem_limit=vmem_limit, single_buffer_consts=True)
    except Exception:
        # Fallback if this jax build rejects pipeline_mode=pl.Buffered(1) on
        # constant-index blocks; only costs the extra weight buffer in VMEM.
        out2d = _mamba_block_2d(x2d, w1_bf, w2_bf, vec, tm=tm,
                                vmem_limit=vmem_limit, single_buffer_consts=False)
    return out2d.reshape(B, S, D)


def _reference(x, w1, b1, w2, b2, gamma, beta):
    h = jnp.maximum(x @ w1 + b1, 0.0)
    y = h @ w2 + b2
    r = x + y
    mean = jnp.mean(r, axis=-1, keepdims=True)
    var = jnp.mean((r - mean) ** 2, axis=-1, keepdims=True)
    return (r - mean) / jnp.sqrt(var + 1e-5) * gamma + beta


if __name__ == "__main__":
    key = jax.random.PRNGKey(0)
    B, S, D = 2, 8, 128  # tokens = 16, dim = 128 lanes

    kx, kw1, kb1, kw2, kb2, kg, kbe = jax.random.split(key, 7)
    # Deterministic synthetic parameters (PyTorch-Linear-like scale: U(-1/sqrt(D), 1/sqrt(D)))
    bound = 1.0 / (D ** 0.5)
    x = jax.random.normal(kx, (B, S, D), dtype=jnp.float32)
    w1 = jax.random.uniform(kw1, (D, D), jnp.float32, -bound, bound)   # = fc1.weight.T
    b1 = jax.random.uniform(kb1, (D,), jnp.float32, -bound, bound)
    w2 = jax.random.uniform(kw2, (D, D), jnp.float32, -bound, bound)   # = fc2.weight.T
    b2 = jax.random.uniform(kb2, (D,), jnp.float32, -bound, bound)
    gamma = jnp.ones((D,), jnp.float32) + 0.01 * jax.random.normal(kg, (D,))
    beta = 0.01 * jax.random.normal(kbe, (D,))

    params = prepare_params(w1, b1, w2, b2, gamma, beta)   # one-time bf16 cast + packing
    out = mamba_encoder_block(x, params)
    out = jax.block_until_ready(out)

    ref = _reference(x, w1, b1, w2, b2, gamma, beta)
    assert out.shape == (B, S, D)
    # bf16 matmuls (with f32 accumulation) -> relaxed tolerance vs the f32 reference
    assert jnp.allclose(out, ref, atol=3e-2, rtol=3e-2), "mismatch vs reference"

    print("KERNEL_OK")
</pallas_src>

<mosaic_0001>
module attributes {stable_mosaic.version = 11 : i64} {
  func.func @_mamba_block_kernel(%arg0: i32, %arg1: memref<16x128xf32, #tpu.memory_space<vmem>>, %arg2: memref<128x128xbf16, #tpu.memory_space<vmem>>, %arg3: memref<128x128xbf16, #tpu.memory_space<vmem>>, %arg4: memref<4x128xf32, #tpu.memory_space<vmem>>, %arg5: memref<16x128xf32, #tpu.memory_space<vmem>>) attributes {dimension_semantics = [#tpu.dimension_semantics<parallel>], iteration_bounds = array<i64: 1>, scalar_prefetch = 0 : i64, scratch_operands = 0 : i64, tpu.core_type = #tpu.core_type<tc>, window_params = [{transform_indices = @transform_0, window_bounds = array<i64: 16, 128>}, {pipeline_mode = #tpu.pipeline_mode<synchronous>, transform_indices = @transform_1, window_bounds = array<i64: 128, 128>}, {pipeline_mode = #tpu.pipeline_mode<synchronous>, transform_indices = @transform_2, window_bounds = array<i64: 128, 128>}, {pipeline_mode = #tpu.pipeline_mode<synchronous>, transform_indices = @transform_3, window_bounds = array<i64: 4, 128>}, {transform_indices = @transform_4, window_bounds = array<i64: 16, 128>}]} {
    %c0 = arith.constant 0 : index
    %c0_0 = arith.constant 0 : index
    %0 = vector.load %arg1[%c0, %c0_0] : memref<16x128xf32, #tpu.memory_space<vmem>>, vector<16x128xf32>
    %1 = arith.truncf %0 : vector<16x128xf32> to vector<16x128xbf16>
    %c0_1 = arith.constant 0 : index
    %c0_2 = arith.constant 0 : index
    %2 = vector.load %arg4[%c0_1, %c0_2] : memref<4x128xf32, #tpu.memory_space<vmem>>, vector<4x128xf32>
    %3 = vector.extract_strided_slice %2 {offsets = [0, 0], sizes = [1, 128], strides = [1, 1]} : vector<4x128xf32> to vector<1x128xf32>
    %4 = vector.extract_strided_slice %2 {offsets = [1, 0], sizes = [1, 128], strides = [1, 1]} : vector<4x128xf32> to vector<1x128xf32>
    %5 = vector.extract_strided_slice %2 {offsets = [2, 0], sizes = [1, 128], strides = [1, 1]} : vector<4x128xf32> to vector<1x128xf32>
    %6 = vector.extract_strided_slice %2 {offsets = [3, 0], sizes = [1, 128], strides = [1, 1]} : vector<4x128xf32> to vector<1x128xf32>
    %c0_3 = arith.constant 0 : index
    %c0_4 = arith.constant 0 : index
    %7 = vector.load %arg2[%c0_3, %c0_4] : memref<128x128xbf16, #tpu.memory_space<vmem>>, vector<128x128xbf16>
    %cst = arith.constant dense<0.000000e+00> : vector<16x128xf32>
    %8 = tpu.matmul %1, %7, %cst {dimension_numbers = #tpu.dot_dimension_numbers<[1], [0], [0], [1], [0, 0, 1, 1], [], []>} : vector<16x128xbf16>, vector<128x128xbf16>, vector<16x128xf32> -> vector<16x128xf32>
    %9 = vector.broadcast %3 : vector<1x128xf32> to vector<16x128xf32>
    %10 = arith.addf %8, %9 : vector<16x128xf32>
    %cst_5 = arith.constant 0.000000e+00 : f32
    %11 = vector.broadcast %cst_5 : f32 to vector<16x128xf32>
    %12 = arith.maximumf %10, %11 : vector<16x128xf32>
    %13 = arith.truncf %12 : vector<16x128xf32> to vector<16x128xbf16>
    %c0_6 = arith.constant 0 : index
    %c0_7 = arith.constant 0 : index
    %14 = vector.load %arg3[%c0_6, %c0_7] : memref<128x128xbf16, #tpu.memory_space<vmem>>, vector<128x128xbf16>
    %cst_8 = arith.constant dense<0.000000e+00> : vector<16x128xf32>
    %15 = tpu.matmul %13, %14, %cst_8 {dimension_numbers = #tpu.dot_dimension_numbers<[1], [0], [0], [1], [0, 0, 1, 1], [], []>} : vector<16x128xbf16>, vector<128x128xbf16>, vector<16x128xf32> -> vector<16x128xf32>
    %16 = vector.broadcast %4 : vector<1x128xf32> to vector<16x128xf32>
    %17 = arith.addf %15, %16 : vector<16x128xf32>
    %18 = arith.addf %0, %17 : vector<16x128xf32>
    %cst_9 = arith.constant dense<0.000000e+00> : vector<16xf32>
    %19 = vector.multi_reduction <add>, %18, %cst_9 [1] : vector<16x128xf32> to vector<16xf32>
    %20 = vector.shape_cast %19 : vector<16xf32> to vector<16x1xf32>
    %cst_10 = arith.constant 1.280000e+02 : f32
    %21 = vector.broadcast %cst_10 : f32 to vector<16x1xf32>
    %22 = arith.divf %20, %21 : vector<16x1xf32>
    %23 = vector.broadcast %22 : vector<16x1xf32> to vector<16x128xf32>
    %24 = arith.subf %18, %23 : vector<16x128xf32>
    %25 = arith.mulf %24, %24 : vector<16x128xf32>
    %cst_11 = arith.constant dense<0.000000e+00> : vector<16xf32>
    %26 = vector.multi_reduction <add>, %25, %cst_11 [1] : vector<16x128xf32> to vector<16xf32>
    %27 = vector.shape_cast %26 : vector<16xf32> to vector<16x1xf32>
    %cst_12 = arith.constant 1.280000e+02 : f32
    %28 = vector.broadcast %cst_12 : f32 to vector<16x1xf32>
    %29 = arith.divf %27, %28 : vector<16x1xf32>
    %cst_13 = arith.constant 9.99999974E-6 : f32
    %30 = vector.broadcast %cst_13 : f32 to vector<16x1xf32>
    %31 = arith.addf %29, %30 : vector<16x1xf32>
    %32 = math.rsqrt %31 : vector<16x1xf32>
    %33 = vector.broadcast %32 : vector<16x1xf32> to vector<16x128xf32>
    %34 = arith.mulf %24, %33 : vector<16x128xf32>
    %35 = vector.broadcast %5 : vector<1x128xf32> to vector<16x128xf32>
    %36 = arith.mulf %34, %35 : vector<16x128xf32>
    %37 = vector.broadcast %6 : vector<1x128xf32> to vector<16x128xf32>
    %38 = arith.addf %36, %37 : vector<16x128xf32>
    %c0_14 = arith.constant 0 : index
    %c0_15 = arith.constant 0 : index
    %39 = vector.load %arg5[%c0_14, %c0_15] : memref<16x128xf32, #tpu.memory_space<vmem>>, vector<16x128xf32>
    tpu.vector_store %arg5[%c0_14, %c0_15], %38 {strides = array<i32>} : memref<16x128xf32, #tpu.memory_space<vmem>>, vector<16x128xf32>,
    return
  }
  func.func @transform_0(%arg0: i32) -> (i32, i32) {
    %c0_i32 = arith.constant 0 : i32
    %c0_i32_0 = arith.constant 0 : i32
    return %arg0, %c0_i32 : i32, i32
  }
  func.func @transform_1(%arg0: i32) -> (i32, i32) {
    %c0_i32 = arith.constant 0 : i32
    %c0_i32_0 = arith.constant 0 : i32
    %c0_i32_1 = arith.constant 0 : i32
    return %c0_i32, %c0_i32_0 : i32, i32
  }
  func.func @transform_2(%arg0: i32) -> (i32, i32) {
    %c0_i32 = arith.constant 0 : i32
    %c0_i32_0 = arith.constant 0 : i32
    %c0_i32_1 = arith.constant 0 : i32
    return %c0_i32, %c0_i32_0 : i32, i32
  }
  func.func @transform_3(%arg0: i32) -> (i32, i32) {
    %c0_i32 = arith.constant 0 : i32
    %c0_i32_0 = arith.constant 0 : i32
    %c0_i32_1 = arith.constant 0 : i32
    return %c0_i32, %c0_i32_0 : i32, i32
  }
  func.func @transform_4(%arg0: i32) -> (i32, i32) {
    %c0_i32 = arith.constant 0 : i32
    %c0_i32_0 = arith.constant 0 : i32
    return %arg0, %c0_i32 : i32, i32
  }
}

module attributes {stable_mosaic.version = 11 : i64} {
  func.func @_mamba_block_kernel(%arg0: i32, %arg1: memref<16x128xf32, #tpu.memory_space<vmem>>, %arg2: memref<128x128xbf16, #tpu.memory_space<vmem>>, %arg3: memref<128x128xbf16, #tpu.memory_space<vmem>>, %arg4: memref<4x128xf32, #tpu.memory_space<vmem>>, %arg5: memref<16x128xf32, #tpu.memory_space<vmem>>) attributes {dimension_semantics = [#tpu.dimension_semantics<parallel>], iteration_bounds = array<i64: 1>, scalar_prefetch = 0 : i64, scratch_operands = 0 : i64, tpu.core_type = #tpu.core_type<tc>, window_params = [{transform_indices = @transform_0, window_bounds = array<i64: 16, 128>}, {pipeline_mode = #tpu.pipeline_mode<synchronous>, transform_indices = @transform_1, window_bounds = array<i64: 128, 128>}, {pipeline_mode = #tpu.pipeline_mode<synchronous>, transform_indices = @transform_2, window_bounds = array<i64: 128, 128>}, {pipeline_mode = #tpu.pipeline_mode<synchronous>, transform_indices = @transform_3, window_bounds = array<i64: 4, 128>}, {transform_indices = @transform_4, window_bounds = array<i64: 16, 128>}]} {
    %c0 = arith.constant 0 : index
    %c0_0 = arith.constant 0 : index
    %0 = vector.load %arg1[%c0, %c0_0] : memref<16x128xf32, #tpu.memory_space<vmem>>, vector<16x128xf32>
    %1 = arith.truncf %0 : vector<16x128xf32> to vector<16x128xbf16>
    %c0_1 = arith.constant 0 : index
    %c0_2 = arith.constant 0 : index
    %2 = vector.load %arg4[%c0_1, %c0_2] : memref<4x128xf32, #tpu.memory_space<vmem>>, vector<4x128xf32>
    %3 = vector.extract_strided_slice %2 {offsets = [0, 0], sizes = [1, 128], strides = [1, 1]} : vector<4x128xf32> to vector<1x128xf32>
    %4 = vector.extract_strided_slice %2 {offsets = [1, 0], sizes = [1, 128], strides = [1, 1]} : vector<4x128xf32> to vector<1x128xf32>
    %5 = vector.extract_strided_slice %2 {offsets = [2, 0], sizes = [1, 128], strides = [1, 1]} : vector<4x128xf32> to vector<1x128xf32>
    %6 = vector.extract_strided_slice %2 {offsets = [3, 0], sizes = [1, 128], strides = [1, 1]} : vector<4x128xf32> to vector<1x128xf32>
    %c0_3 = arith.constant 0 : index
    %c0_4 = arith.constant 0 : index
    %7 = vector.load %arg2[%c0_3, %c0_4] : memref<128x128xbf16, #tpu.memory_space<vmem>>, vector<128x128xbf16>
    %cst = arith.constant dense<0.000000e+00> : vector<16x128xf32>
    %8 = tpu.matmul %1, %7, %cst {dimension_numbers = #tpu.dot_dimension_numbers<[1], [0], [0], [1], [0, 0, 1, 1], [], []>} : vector<16x128xbf16>, vector<128x128xbf16>, vector<16x128xf32> -> vector<16x128xf32>
    %9 = vector.broadcast %3 : vector<1x128xf32> to vector<16x128xf32>
    %10 = arith.addf %8, %9 : vector<16x128xf32>
    %cst_5 = arith.constant 0.000000e+00 : f32
    %11 = vector.broadcast %cst_5 : f32 to vector<16x128xf32>
    %12 = arith.maximumf %10, %11 : vector<16x128xf32>
    %13 = arith.truncf %12 : vector<16x128xf32> to vector<16x128xbf16>
    %c0_6 = arith.constant 0 : index
    %c0_7 = arith.constant 0 : index
    %14 = vector.load %arg3[%c0_6, %c0_7] : memref<128x128xbf16, #tpu.memory_space<vmem>>, vector<128x128xbf16>
    %cst_8 = arith.constant dense<0.000000e+00> : vector<16x128xf32>
    %15 = tpu.matmul %13, %14, %cst_8 {dimension_numbers = #tpu.dot_dimension_numbers<[1], [0], [0], [1], [0, 0, 1, 1], [], []>} : vector<16x128xbf16>, vector<128x128xbf16>, vector<16x128xf32> -> vector<16x128xf32>
    %16 = vector.broadcast %4 : vector<1x128xf32> to vector<16x128xf32>
    %17 = arith.addf %15, %16 : vector<16x128xf32>
    %18 = arith.addf %0, %17 : vector<16x128xf32>
    %cst_9 = arith.constant dense<0.000000e+00> : vector<16xf32>
    %19 = vector.multi_reduction <add>, %18, %cst_9 [1] : vector<16x128xf32> to vector<16xf32>
    %20 = vector.shape_cast %19 : vector<16xf32> to vector<16x1xf32>
    %cst_10 = arith.constant 1.280000e+02 : f32
    %21 = vector.broadcast %cst_10 : f32 to vector<16x1xf32>
    %22 = arith.divf %20, %21 : vector<16x1xf32>
    %23 = vector.broadcast %22 : vector<16x1xf32> to vector<16x128xf32>
    %24 = arith.subf %18, %23 : vector<16x128xf32>
    %25 = arith.mulf %24, %24 : vector<16x128xf32>
    %cst_11 = arith.constant dense<0.000000e+00> : vector<16xf32>
    %26 = vector.multi_reduction <add>, %25, %cst_11 [1] : vector<16x128xf32> to vector<16xf32>
    %27 = vector.shape_cast %26 : vector<16xf32> to vector<16x1xf32>
    %cst_12 = arith.constant 1.280000e+02 : f32
    %28 = vector.broadcast %cst_12 : f32 to vector<16x1xf32>
    %29 = arith.divf %27, %28 : vector<16x1xf32>
    %cst_13 = arith.constant 9.99999974E-6 : f32
    %30 = vector.broadcast %cst_13 : f32 to vector<16x1xf32>
    %31 = arith.addf %29, %30 : vector<16x1xf32>
    %32 = math.rsqrt %31 : vector<16x1xf32>
    %33 = vector.broadcast %32 : vector<16x1xf32> to vector<16x128xf32>
    %34 = arith.mulf %24, %33 : vector<16x128xf32>
    %35 = vector.broadcast %5 : vector<1x128xf32> to vector<16x128xf32>
    %36 = arith.mulf %34, %35 : vector<16x128xf32>
    %37 = vector.broadcast %6 : vector<1x128xf32> to vector<16x128xf32>
    %38 = arith.addf %36, %37 : vector<16x128xf32>
    %c0_14 = arith.constant 0 : index
    %c0_15 = arith.constant 0 : index
    %39 = vector.load %arg5[%c0_14, %c0_15] : memref<16x128xf32, #tpu.memory_space<vmem>>, vector<16x128xf32>
    tpu.vector_store %arg5[%c0_14, %c0_15], %38 {strides = array<i32>} : memref<16x128xf32, #tpu.memory_space<vmem>>, vector<16x128xf32>,
    return
  }
  func.func @transform_0(%arg0: i32) -> (i32, i32) {
    %c0_i32 = arith.constant 0 : i32
    %c0_i32_0 = arith.constant 0 : i32
    return %arg0, %c0_i32 : i32, i32
  }
  func.func @transform_1(%arg0: i32) -> (i32, i32) {
    %c0_i32 = arith.constant 0 : i32
    %c0_i32_0 = arith.constant 0 : i32
    %c0_i32_1 = arith.constant 0 : i32
    return %c0_i32, %c0_i32_0 : i32, i32
  }
  func.func @transform_2(%arg0: i32) -> (i32, i32) {
    %c0_i32 = arith.constant 0 : i32
    %c0_i32_0 = arith.constant 0 : i32
    %c0_i32_1 = arith.constant 0 : i32
    return %c0_i32, %c0_i32_0 : i32, i32
  }
  func.func @transform_3(%arg0: i32) -> (i32, i32) {
    %c0_i32 = arith.constant 0 : i32
    %c0_i32_0 = arith.constant 0 : i32
    %c0_i32_1 = arith.constant 0 : i32
    return %c0_i32, %c0_i32_0 : i32, i32
  }
  func.func @transform_4(%arg0: i32) -> (i32, i32) {
    %c0_i32 = arith.constant 0 : i32
    %c0_i32_0 = arith.constant 0 : i32
    return %arg0, %c0_i32 : i32, i32
  }
}

</mosaic_0001>

<bundles_post_ra>
// kernel: _mamba_block_2d.1
= control target key start
LH: loop header
LB: loop body
LE: loop exit
PB: predicated region body
PF: predicated region fallthrough
CT: control target
= control target key end

     0   :  { %9 = vsyncpa [#allocation3], 0  ;;  %s588_s0 = inlined_call_operand.hbm [shape: f32[16,128], index: 0, kind: input, shape index: {}]   ;;  %s589_s1 = inlined_call_operand.hbm [shape: bf16[128,128], index: 1, kind: input, shape index: {}]   ;;  %s590_s2 = inlined_call_operand.hbm [shape: bf16[128,128], index: 2, kind: input, shape index: {}]   ;;  %s591_s3 = inlined_call_operand.vmem [shape: f32[4,128], index: 3, kind: input, shape index: {}]   ;;  %s592_s4 = inlined_call_operand.hbm [shape: f32[16,128], index: 4, kind: output, shape index: {}]  }
   0x1   :  { %10 = vsyncpa [#allocation6], 0 }
   0x2   :  { %11 = vsyncpa [#allocation4], 0  ;;  %s532_s15 = smov [#allocation5]  }
   0x3   :  { %s29_s16 = sshll.u32 %s532_s15, 4  ;;  %s30_s16 = int_to_ptr.vmem [resolvable:$true] %s29_s16 }
   0x4   :  { %s454_s17 = scalar_lea.vmem %s30_s16, 1024  ;;  %p459_p1 = scmp.lt.s32.totalorder %s30_s16, %s30_s16 }
   0x5   :  { %p455_p0 = scmp.ne.s32.totalorder %s30_s16, %s454_s17  ;;  %p460_p2 = scmp.lt.s32.totalorder %s454_s17, %s454_s17 }
   0x7   :  { %p461_p3 = por %p460_p2, %p459_p1 }
   0x9   :  { %p462_p4 = pnand %p461_p3, %p455_p0 }
   0xb   :  { %465 = shalt.err (!%p462_p4)
}
   0xc   :  { %s533_s18 = smov 64   ;;  %s534_s19 = smov 4  }
   0xd   :  { %35 = dma.hbm_to_vmem [thread:$0]  %s589_s1, 1024, %s30_s16, [#allocation6], %s533_s18, %s533_s18, %s534_s19  }
   0xe   :  { %s535_s22 = smov [#allocation2]  }
   0xf   :  { %s17_s23 = sshll.u32 %s535_s22, 4  ;;  %s18_s23 = int_to_ptr.vmem [resolvable:$true] %s17_s23 }
  0x10   :  { %s474_s24 = scalar_lea.vmem %s18_s23, 256  ;;  %p479_p6 = scmp.lt.s32.totalorder %s18_s23, %s18_s23 }
  0x11   :  { %p475_p5 = scmp.ne.s32.totalorder %s18_s23, %s474_s24  ;;  %p480_p7 = scmp.lt.s32.totalorder %s474_s24, %s474_s24 }
  0x13   :  { %p481_p8 = por %p480_p7, %p479_p6 }
  0x15   :  { %p482_p9 = pnand %p481_p8, %p475_p5 }
  0x17   :  { %485 = shalt.err (!%p482_p9)
}
  0x18   :  { %s536_s25 = smov 128   ;;  %s537_s26 = smov 8  }
  0x19   :  { %23 = dma.hbm_to_vmem [thread:$0]  %s588_s0, 256, %s18_s23, [#allocation3], %s536_s25, %s536_s25, %s537_s26  }
  0x1a   :  { %s538_s1 = smov [#allocation7]  }
  0x1b   :  { %s41_s29 = sshll.u32 %s538_s1, 4  ;;  %s42_s29 = int_to_ptr.vmem [resolvable:$true] %s41_s29 }
  0x1c   :  { %s494_s30 = scalar_lea.vmem %s42_s29, 1024  ;;  %p499_p11 = scmp.lt.s32.totalorder %s42_s29, %s42_s29 }
  0x1d   :  { %p495_p10 = scmp.ne.s32.totalorder %s42_s29, %s494_s30  ;;  %p500_p12 = scmp.lt.s32.totalorder %s494_s30, %s494_s30 }
  0x1f   :  { %p501_p13 = por %p500_p12, %p499_p11 }
  0x21   :  { %p502_p0 = pnand %p501_p13, %p495_p10 }
  0x23   :  { %505 = shalt.err (!%p502_p0)
}
  0x24   :  { %47 = dma.hbm_to_vmem [thread:$0]  %s590_s2, 1024, %s42_s29, [#allocation6], %s533_s18, %s533_s18, %s534_s19  }
  0x25   :  { %526 = dma.done.wait [#allocation3], 256  }
  0x26   :  { %527 = vsyncadd [#allocation3], 4294967040 }
  0x27   :  { %528 = dma.done.wait [#allocation6], 2048  }
  0x28   :  { %529 = vsyncadd [#allocation6], 4294965248  ;;  %v539_v0 = vmov 0.0   ;;  %vm540_vm0 = vmmov 0   ;;  %v426_v1 = vld [vmem:[#allocation5 + $0x38] sm:$0xff]   ;;  %v427_v2 = vld [vmem:[#allocation5 + $0x30] sm:$0xff]   ;;  %v80_v20 = vlaneseq }
  0x29   :  { %376 = vmatprep.subr.bf16.mxu0 %v539_v0  ;;  %392 = vmatprep.mubr.msk.bf16.mxu0 %vm540_vm0, %v539_v0  ;;  %v428_v3 = vld [vmem:[#allocation5 + $0x28] sm:$0xff]   ;;  %v434_v4 = vld [vmem:[#allocation7 + $0x38] sm:$0xff]   ;;  %v429_v5 = vld [vmem:[#allocation5 + $0x20] sm:$0xff]  }
  0x2a   :  { %396 = vmatprep.subr.bf16.mxu1 %v539_v0  ;;  %412 = vmatprep.mubr.msk.bf16.mxu1 %vm540_vm0, %v539_v0  ;;  %v435_v6 = vld [vmem:[#allocation7 + $0x30] sm:$0xff]   ;;  %v430_v7 = vld [vmem:[#allocation5 + $0x18] sm:$0xff]   ;;  %v436_v8 = vld [vmem:[#allocation7 + $0x28] sm:$0xff]   ;;  %v81_v21 = vshrl.u32 %v80_v20, 7 }
  0x2b   :  { %377 = vmatpush3.bf16.msra.mxu0 %v426_v1  ;;  %397 = vmatpush3.bf16.msra.mxu1 %v434_v4  ;;  %v431_v9 = vld [vmem:[#allocation5 + $0x10] sm:$0xff]   ;;  %v437_v10 = vld [vmem:[#allocation7 + $0x20] sm:$0xff]   ;;  %v432_v11 = vld [vmem:[#allocation5 + $0x8] sm:$0xff]  }
  0x2c   :  { %378 = vmatprep.subr.bf16.mxu0 %v539_v0  ;;  %398 = vmatprep.subr.bf16.mxu1 %v539_v0  ;;  %v438_v12 = vld [vmem:[#allocation7 + $0x18] sm:$0xff]   ;;  %v433_v13 = vld [vmem:[#allocation5] sm:$0xff]   ;;  %v60_v14 = vld [vmem:[#allocation2] sm:$0xff]  ;;  %v82_v22 = vsub.s32 0, %v81_v21  ;;  %v194_v34 = vsub.s32 1, %v81_v21  ;;  %v312_v58 = vsub.s32 2, %v81_v21 }
  0x2d   :  { %v61_v15 = vld [vmem:[#allocation2 + $0x8] sm:$0xff]  ;;  %v439_v17 = vld [vmem:[#allocation7 + $0x10] sm:$0xff]   ;;  %v440_v18 = vld [vmem:[#allocation7 + $0x8] sm:$0xff]   ;;  %v318_v59 = vsub.s32 3, %v81_v21 }
  0x2e   :  { %v62_v16 = vpack.c.bf16 %v61_v15, %v60_v14  ;;  %v441_v19 = vld [vmem:[#allocation7] sm:$0xff]   ;;  %v63_v23 = vld [vmem:[%s591_s3] sm:$0xf]  ;;  %s541_s3 = smov [#allocation8]  }
  0x2f   :  { %379 = vmatpush3.bf16.msra.mxu0 %v427_v2  ;;  %399 = vmatpush3.bf16.msra.mxu1 %v435_v6  ;;  %v83_v24 = vrot.slane %v63_v23, %v82_v22  ;;  %v195_v35 = vrot.slane %v63_v23, %v194_v34  ;;  %v313_v60 = vrot.slane %v63_v23, %v312_v58  ;;  %s329_s7 = sshll.u32 %s541_s3, 4  ;;  %s330_s7 = int_to_ptr.vmem [resolvable:$true] %s329_s7 }
  0x30   :  { %380 = vmatprep.subr.bf16.mxu0 %v539_v0  ;;  %400 = vmatprep.subr.bf16.mxu1 %v539_v0  ;;  %v319_v63 = vrot.slane %v63_v23, %v318_v59  ;;  %s506_s8 = scalar_lea.vmem %s330_s7, 256  ;;  %p511_p2 = scmp.lt.s32.totalorder %s330_s7, %s330_s7 }
  0x31   :  { %p507_p1 = scmp.ne.s32.totalorder %s330_s7, %s506_s8  ;;  %p512_p3 = scmp.lt.s32.totalorder %s506_s8, %s506_s8 }
  0x33   :  { %381 = vmatpush3.bf16.msra.mxu0 %v428_v3  ;;  %401 = vmatpush3.bf16.msra.mxu1 %v436_v8  ;;  %p513_p4 = por %p512_p3, %p511_p2 }
  0x34   :  { %382 = vmatprep.subr.bf16.mxu0 %v539_v0  ;;  %402 = vmatprep.subr.bf16.mxu1 %v539_v0 }
  0x35   :  { %p514_p5 = pnand %p513_p4, %p507_p1 }
  0x37   :  { %383 = vmatpush3.bf16.msra.mxu0 %v429_v5  ;;  %403 = vmatpush3.bf16.msra.mxu1 %v437_v10 }
  0x38   :  { %384 = vmatprep.subr.bf16.mxu0 %v539_v0  ;;  %404 = vmatprep.subr.bf16.mxu1 %v539_v0 }
  0x3b   :  { %385 = vmatpush3.bf16.msra.mxu0 %v430_v7  ;;  %405 = vmatpush3.bf16.msra.mxu1 %v438_v12 }
  0x3c   :  { %386 = vmatprep.subr.bf16.mxu0 %v539_v0  ;;  %406 = vmatprep.subr.bf16.mxu1 %v539_v0 }
  0x3f   :  { %387 = vmatpush3.bf16.msra.mxu0 %v431_v9  ;;  %407 = vmatpush3.bf16.msra.mxu1 %v439_v17 }
  0x40   :  { %388 = vmatprep.subr.bf16.mxu0 %v539_v0  ;;  %408 = vmatprep.subr.bf16.mxu1 %v539_v0 }
  0x43   :  { %389 = vmatpush3.bf16.msra.mxu0 %v432_v11  ;;  %409 = vmatpush3.bf16.msra.mxu1 %v440_v18 }
  0x44   :  { %390 = vmatprep.subr.bf16.mxu0 %v539_v0  ;;  %410 = vmatprep.subr.bf16.mxu1 %v539_v0 }
  0x47   :  { %391 = vmatpush3.bf16.msra.mxu0 %v433_v13  ;;  %411 = vmatpush3.bf16.msra.mxu1 %v441_v19 }
  0x4a   :  { %393 = vmatmul.mubr.bf16.vlgmr.msra.gmra.mxu0 %v62_v16 }
 0x10a   :  { %v166_v25 = vpop.f32.mrf.mxu0 }
 0x10b   :  { %v167_v27 = vadd.f32 %v166_v25, %v83_v24 }
 0x10c   :  { %v394_v26 = vpop.f32.mrf.mxu0 }
 0x10d   :  { %v173_v31 = vmax.f32 %v167_v27, 0.0 }
 0x10e   :  { %v169_v28 = vpop.f32.mrf.mxu0 }
 0x10f   :  { %v170_v29 = vadd.f32 %v169_v28, %v83_v24 }
 0x110   :  { %v395_v30 = vpop.f32.mrf.mxu0 }
 0x111   :  { %v174_v32 = vmax.f32 %v170_v29, 0.0 }
 0x113   :  { %v175_v33 = vpack.c.bf16 %v174_v32, %v173_v31 }
 0x115   :  { %413 = vmatmul.mubr.bf16.vlgmr.msra.gmra.mxu1 %v175_v33 }
 0x1d5   :  { %v278_v36 = vpop.f32.mrf.mxu1 }
 0x1d6   :  { %v279_v37 = vadd.f32 %v278_v36, %v195_v35 }
 0x1d7   :  { %v414_v38 = vpop.f32.mrf.mxu1 }
 0x1d8   :  { %v285_v39 = vadd.f32 %v279_v37, %v60_v14 }
 0x1d9   :  { %v281_v40 = vpop.f32.mrf.mxu1 }
 0x1da   :  { %v282_v41 = vadd.f32 %v281_v40, %v195_v35  ;;  %287 = vadd.xlane.f32.xlu0 %v285_v39 }
 0x1db   :  { %v415_v42 = vpop.f32.mrf.mxu1 }
 0x1dc   :  { %v286_v43 = vadd.f32 %v282_v41, %v61_v15 }
 0x1de   :  { %289 = vadd.xlane.f32.xlu0 %v286_v43 }
 0x263   :  { %v288_v44 = vpop.xlane.xlu0 %287 }
 0x264   :  { %v292_v45 = vmul.f32 0.0078125, %v288_v44 }
 0x266   :  { %v294_v46 = vsub.f32 %v285_v39, %v292_v45 }
 0x267   :  { %v290_v47 = vpop.xlane.xlu0 %289 }
 0x268   :  { %v293_v48 = vmul.f32 0.0078125, %v290_v47  ;;  %v296_v49 = vmul.f32 %v294_v46, %v294_v46 }
 0x26a   :  { %v295_v50 = vsub.f32 %v286_v43, %v293_v48  ;;  %298 = vadd.xlane.f32.xlu1 %v296_v49 }
 0x26c   :  { %v297_v51 = vmul.f32 %v295_v50, %v295_v50 }
 0x26e   :  { %300 = vadd.xlane.f32.xlu1 %v297_v51 }
 0x2f3   :  { %v299_v52 = vpop.xlane.xlu1 %298 }
 0x2f4   :  { %v302_v53 = vmul.f32 0.0078125, %v299_v52 }
 0x2f6   :  { %v304_v54 = vadd.f32 1e-05, %v302_v53 }
 0x2f7   :  { %v301_v55 = vpop.xlane.xlu1 %300 }
 0x2f8   :  { %442 = vrsqrt.f32 %v304_v54  ;;  %v303_v56 = vmul.f32 0.0078125, %v301_v55 }
 0x2fa   :  { %v305_v57 = vadd.f32 1e-05, %v303_v56 }
 0x2fc   :  { %444 = vrsqrt.f32 %v305_v57 }
 0x305   :  { %v443_v61 = vpop.eup %442 }
 0x306   :  { %v308_v62 = vmul.f32 %v443_v61, %v294_v46 }
 0x308   :  { %v314_v0 = vmul.f32 %v313_v60, %v308_v62 }
 0x309   :  { %v445_v1 = vpop.eup %444 }
 0x30a   :  { %v309_v2 = vmul.f32 %v445_v1, %v295_v50  ;;  %v320_v3 = vadd.f32 %v319_v63, %v314_v0 }
 0x30c   :  { %v315_v4 = vmul.f32 %v313_v60, %v309_v2  ;;  %322 = vst [vmem:[#allocation8] sm:$0xff] %v320_v3 }
 0x30e   :  { %v321_v5 = vadd.f32 %v319_v63, %v315_v4 }
 0x310   :  { %323 = vst [vmem:[#allocation8 + $0x8] sm:$0xff] %v321_v5 }
 0x311   :  { %517 = shalt.err (!%p514_p5)
}
 0x312   :  { %335 = dma.vmem_to_hbm [thread:$0]  %s330_s7, 256, %s592_s4, [#allocation4], %s536_s25, %s536_s25, %s537_s26  }
 0x313   :  { %530 = dma.done.wait [#allocation4], 256  }
 0x314   :  { %531 = vsyncadd [#allocation4], 4294967040 }
 0x315   :  { %339 = vsyncpa [#allocation3], 1 }
 0x316   :  { %340 = vsyncpa [#allocation6], 1 }
 0x317   :  { %341 = vsyncpa [#allocation4], 1 }

// kernel: _mamba_block_2d.1
= control target key start
LH: loop header
LB: loop body
LE: loop exit
PB: predicated region body
PF: predicated region fallthrough
CT: control target
= control target key end

     0   :  { %9 = vsyncpa [#allocation3], 0  ;;  %s588_s0 = inlined_call_operand.hbm [shape: f32[16,128], index: 0, kind: input, shape index: {}]   ;;  %s589_s1 = inlined_call_operand.hbm [shape: bf16[128,128], index: 1, kind: input, shape index: {}]   ;;  %s590_s2 = inlined_call_operand.hbm [shape: bf16[128,128], index: 2, kind: input, shape index: {}]   ;;  %s591_s3 = inlined_call_operand.vmem [shape: f32[4,128], index: 3, kind: input, shape index: {}]   ;;  %s592_s4 = inlined_call_operand.hbm [shape: f32[16,128], index: 4, kind: output, shape index: {}]  }
   0x1   :  { %10 = vsyncpa [#allocation6], 0 }
   0x2   :  { %11 = vsyncpa [#allocation4], 0  ;;  %s532_s15 = smov [#allocation5]  }
   0x3   :  { %s29_s16 = sshll.u32 %s532_s15, 4  ;;  %s30_s16 = int_to_ptr.vmem [resolvable:$true] %s29_s16 }
   0x4   :  { %s454_s17 = scalar_lea.vmem %s30_s16, 1024  ;;  %p459_p1 = scmp.lt.s32.totalorder %s30_s16, %s30_s16 }
   0x5   :  { %p455_p0 = scmp.ne.s32.totalorder %s30_s16, %s454_s17  ;;  %p460_p2 = scmp.lt.s32.totalorder %s454_s17, %s454_s17 }
   0x7   :  { %p461_p3 = por %p460_p2, %p459_p1 }
   0x9   :  { %p462_p4 = pnand %p461_p3, %p455_p0 }
   0xb   :  { %465 = shalt.err (!%p462_p4)
}
   0xc   :  { %s533_s18 = smov 64   ;;  %s534_s19 = smov 4  }
   0xd   :  { %35 = dma.hbm_to_vmem [thread:$0]  %s589_s1, 1024, %s30_s16, [#allocation6], %s533_s18, %s533_s18, %s534_s19  }
   0xe   :  { %s535_s22 = smov [#allocation2]  }
   0xf   :  { %s17_s23 = sshll.u32 %s535_s22, 4  ;;  %s18_s23 = int_to_ptr.vmem [resolvable:$true] %s17_s23 }
  0x10   :  { %s474_s24 = scalar_lea.vmem %s18_s23, 256  ;;  %p479_p6 = scmp.lt.s32.totalorder %s18_s23, %s18_s23 }
  0x11   :  { %p475_p5 = scmp.ne.s32.totalorder %s18_s23, %s474_s24  ;;  %p480_p7 = scmp.lt.s32.totalorder %s474_s24, %s474_s24 }
  0x13   :  { %p481_p8 = por %p480_p7, %p479_p6 }
  0x15   :  { %p482_p9 = pnand %p481_p8, %p475_p5 }
  0x17   :  { %485 = shalt.err (!%p482_p9)
}
  0x18   :  { %s536_s25 = smov 128   ;;  %s537_s26 = smov 8  }
  0x19   :  { %23 = dma.hbm_to_vmem [thread:$0]  %s588_s0, 256, %s18_s23, [#allocation3], %s536_s25, %s536_s25, %s537_s26  }
  0x1a   :  { %s538_s1 = smov [#allocation7]  }
  0x1b   :  { %s41_s29 = sshll.u32 %s538_s1, 4  ;;  %s42_s29 = int_to_ptr.vmem [resolvable:$true] %s41_s29 }
  0x1c   :  { %s494_s30 = scalar_lea.vmem %s42_s29, 1024  ;;  %p499_p11 = scmp.lt.s32.totalorder %s42_s29, %s42_s29 }
  0x1d   :  { %p495_p10 = scmp.ne.s32.totalorder %s42_s29, %s494_s30  ;;  %p500_p12 = scmp.lt.s32.totalorder %s494_s30, %s494_s30 }
  0x1f   :  { %p501_p13 = por %p500_p12, %p499_p11 }
  0x21   :  { %p502_p0 = pnand %p501_p13, %p495_p10 }
  0x23   :  { %505 = shalt.err (!%p502_p0)
}
  0x24   :  { %47 = dma.hbm_to_vmem [thread:$0]  %s590_s2, 1024, %s42_s29, [#allocation6], %s533_s18, %s533_s18, %s534_s19  }
  0x25   :  { %526 = dma.done.wait [#allocation3], 256  }
  0x26   :  { %527 = vsyncadd [#allocation3], 4294967040 }
  0x27   :  { %528 = dma.done.wait [#allocation6], 2048  }
  0x28   :  { %529 = vsyncadd [#allocation6], 4294965248  ;;  %v539_v0 = vmov 0.0   ;;  %vm540_vm0 = vmmov 0   ;;  %v426_v1 = vld [vmem:[#allocation5 + $0x38] sm:$0xff]   ;;  %v427_v2 = vld [vmem:[#allocation5 + $0x30] sm:$0xff]   ;;  %v80_v20 = vlaneseq }
  0x29   :  { %376 = vmatprep.subr.bf16.mxu0 %v539_v0  ;;  %392 = vmatprep.mubr.msk.bf16.mxu0 %vm540_vm0, %v539_v0  ;;  %v428_v3 = vld [vmem:[#allocation5 + $0x28] sm:$0xff]   ;;  %v434_v4 = vld [vmem:[#allocation7 + $0x38] sm:$0xff]   ;;  %v429_v5 = vld [vmem:[#allocation5 + $0x20] sm:$0xff]  }
  0x2a   :  { %396 = vmatprep.subr.bf16.mxu1 %v539_v0  ;;  %412 = vmatprep.mubr.msk.bf16.mxu1 %vm540_vm0, %v539_v0  ;;  %v435_v6 = vld [vmem:[#allocation7 + $0x30] sm:$0xff]   ;;  %v430_v7 = vld [vmem:[#allocation5 + $0x18] sm:$0xff]   ;;  %v436_v8 = vld [vmem:[#allocation7 + $0x28] sm:$0xff]   ;;  %v81_v21 = vshrl.u32 %v80_v20, 7 }
  0x2b   :  { %377 = vmatpush3.bf16.msra.mxu0 %v426_v1  ;;  %397 = vmatpush3.bf16.msra.mxu1 %v434_v4  ;;  %v431_v9 = vld [vmem:[#allocation5 + $0x10] sm:$0xff]   ;;  %v437_v10 = vld [vmem:[#allocation7 + $0x20] sm:$0xff]   ;;  %v432_v11 = vld [vmem:[#allocation5 + $0x8] sm:$0xff]  }
  0x2c   :  { %378 = vmatprep.subr.bf16.mxu0 %v539_v0  ;;  %398 = vmatprep.subr.bf16.mxu1 %v539_v0  ;;  %v438_v12 = vld [vmem:[#allocation7 + $0x18] sm:$0xff]   ;;  %v433_v13 = vld [vmem:[#allocation5] sm:$0xff]   ;;  %v60_v14 = vld [vmem:[#allocation2] sm:$0xff]  ;;  %v82_v22 = vsub.s32 0, %v81_v21  ;;  %v194_v34 = vsub.s32 1, %v81_v21  ;;  %v312_v58 = vsub.s32 2, %v81_v21 }
  0x2d   :  { %v61_v15 = vld [vmem:[#allocation2 + $0x8] sm:$0xff]  ;;  %v439_v17 = vld [vmem:[#allocation7 + $0x10] sm:$0xff]   ;;  %v440_v18 = vld [vmem:[#allocation7 + $0x8] sm:$0xff]   ;;  %v318_v59 = vsub.s32 3, %v81_v21 }
  0x2e   :  { %v62_v16 = vpack.c.bf16 %v61_v15, %v60_v14  ;;  %v441_v19 = vld [vmem:[#allocation7] sm:$0xff]   ;;  %v63_v23 = vld [vmem:[%s591_s3] sm:$0xf]  ;;  %s541_s3 = smov [#allocation8]  }
  0x2f   :  { %379 = vmatpush3.bf16.msra.mxu0 %v427_v2  ;;  %399 = vmatpush3.bf16.msra.mxu1 %v435_v6  ;;  %v83_v24 = vrot.slane %v63_v23, %v82_v22  ;;  %v195_v35 = vrot.slane %v63_v23, %v194_v34  ;;  %v313_v60 = vrot.slane %v63_v23, %v312_v58  ;;  %s329_s7 = sshll.u32 %s541_s3, 4  ;;  %s330_s7 = int_to_ptr.vmem [resolvable:$true] %s329_s7 }
  0x30   :  { %380 = vmatprep.subr.bf16.mxu0 %v539_v0  ;;  %400 = vmatprep.subr.bf16.mxu1 %v539_v0  ;;  %v319_v63 = vrot.slane %v63_v23, %v318_v59  ;;  %s506_s8 = scalar_lea.vmem %s330_s7, 256  ;;  %p511_p2 = scmp.lt.s32.totalorder %s330_s7, %s330_s7 }
  0x31   :  { %p507_p1 = scmp.ne.s32.totalorder %s330_s7, %s506_s8  ;;  %p512_p3 = scmp.lt.s32.totalorder %s506_s8, %s506_s8 }
  0x33   :  { %381 = vmatpush3.bf16.msra.mxu0 %v428_v3  ;;  %401 = vmatpush3.bf16.msra.mxu1 %v436_v8  ;;  %p513_p4 = por %p512_p3, %p511_p2 }
  0x34   :  { %382 = vmatprep.subr.bf16.mxu0 %v539_v0  ;;  %402 = vmatprep.subr.bf16.mxu1 %v539_v0 }
  0x35   :  { %p514_p5 = pnand %p513_p4, %p507_p1 }
  0x37   :  { %383 = vmatpush3.bf16.msra.mxu0 %v429_v5  ;;  %403 = vmatpush3.bf16.msra.mxu1 %v437_v10 }
  0x38   :  { %384 = vmatprep.subr.bf16.mxu0 %v539_v0  ;;  %404 = vmatprep.subr.bf16.mxu1 %v539_v0 }
  0x3b   :  { %385 = vmatpush3.bf16.msra.mxu0 %v430_v7  ;;  %405 = vmatpush3.bf16.msra.mxu1 %v438_v12 }
  0x3c   :  { %386 = vmatprep.subr.bf16.mxu0 %v539_v0  ;;  %406 = vmatprep.subr.bf16.mxu1 %v539_v0 }
  0x3f   :  { %387 = vmatpush3.bf16.msra.mxu0 %v431_v9  ;;  %407 = vmatpush3.bf16.msra.mxu1 %v439_v17 }
  0x40   :  { %388 = vmatprep.subr.bf16.mxu0 %v539_v0  ;;  %408 = vmatprep.subr.bf16.mxu1 %v539_v0 }
  0x43   :  { %389 = vmatpush3.bf16.msra.mxu0 %v432_v11  ;;  %409 = vmatpush3.bf16.msra.mxu1 %v440_v18 }
  0x44   :  { %390 = vmatprep.subr.bf16.mxu0 %v539_v0  ;;  %410 = vmatprep.subr.bf16.mxu1 %v539_v0 }
  0x47   :  { %391 = vmatpush3.bf16.msra.mxu0 %v433_v13  ;;  %411 = vmatpush3.bf16.msra.mxu1 %v441_v19 }
  0x4a   :  { %393 = vmatmul.mubr.bf16.vlgmr.msra.gmra.mxu0 %v62_v16 }
 0x10a   :  { %v166_v25 = vpop.f32.mrf.mxu0 }
 0x10b   :  { %v167_v27 = vadd.f32 %v166_v25, %v83_v24 }
 0x10c   :  { %v394_v26 = vpop.f32.mrf.mxu0 }
 0x10d   :  { %v173_v31 = vmax.f32 %v167_v27, 0.0 }
 0x10e   :  { %v169_v28 = vpop.f32.mrf.mxu0 }
 0x10f   :  { %v170_v29 = vadd.f32 %v169_v28, %v83_v24 }
 0x110   :  { %v395_v30 = vpop.f32.mrf.mxu0 }
 0x111   :  { %v174_v32 = vmax.f32 %v170_v29, 0.0 }
 0x113   :  { %v175_v33 = vpack.c.bf16 %v174_v32, %v173_v31 }
 0x115   :  { %413 = vmatmul.mubr.bf16.vlgmr.msra.gmra.mxu1 %v175_v33 }
 0x1d5   :  { %v278_v36 = vpop.f32.mrf.mxu1 }
 0x1d6   :  { %v279_v37 = vadd.f32 %v278_v36, %v195_v35 }
 0x1d7   :  { %v414_v38 = vpop.f32.mrf.mxu1 }
 0x1d8   :  { %v285_v39 = vadd.f32 %v279_v37, %v60_v14 }
 0x1d9   :  { %v281_v40 = vpop.f32.mrf.mxu1 }
 0x1da   :  { %v282_v41 = vadd.f32 %v281_v40, %v195_v35  ;;  %287 = vadd.xlane.f32.xlu0 %v285_v39 }
 0x1db   :  { %v415_v42 = vpop.f32.mrf.mxu1 }
 0x1dc   :  { %v286_v43 = vadd.f32 %v282_v41, %v61_v15 }
 0x1de   :  { %289 = vadd.xlane.f32.xlu0 %v286_v43 }
 0x263   :  { %v288_v44 = vpop.xlane.xlu0 %287 }
 0x264   :  { %v292_v45 = vmul.f32 0.0078125, %v288_v44 }
 0x266   :  { %v294_v46 = vsub.f32 %v285_v39, %v292_v45 }
 0x267   :  { %v290_v47 = vpop.xlane.xlu0 %289 }
 0x268   :  { %v293_v48 = vmul.f32 0.0078125, %v290_v47  ;;  %v296_v49 = vmul.f32 %v294_v46, %v294_v46 }
 0x26a   :  { %v295_v50 = vsub.f32 %v286_v43, %v293_v48  ;;  %298 = vadd.xlane.f32.xlu1 %v296_v49 }
 0x26c   :  { %v297_v51 = vmul.f32 %v295_v50, %v295_v50 }
 0x26e   :  { %300 = vadd.xlane.f32.xlu1 %v297_v51 }
 0x2f3   :  { %v299_v52 = vpop.xlane.xlu1 %298 }
 0x2f4   :  { %v302_v53 = vmul.f32 0.0078125, %v299_v52 }
 0x2f6   :  { %v304_v54 = vadd.f32 1e-05, %v302_v53 }
 0x2f7   :  { %v301_v55 = vpop.xlane.xlu1 %300 }
 0x2f8   :  { %442 = vrsqrt.f32 %v304_v54  ;;  %v303_v56 = vmul.f32 0.0078125, %v301_v55 }
 0x2fa   :  { %v305_v57 = vadd.f32 1e-05, %v303_v56 }
 0x2fc   :  { %444 = vrsqrt.f32 %v305_v57 }
 0x305   :  { %v443_v61 = vpop.eup %442 }
 0x306   :  { %v308_v62 = vmul.f32 %v443_v61, %v294_v46 }
 0x308   :  { %v314_v0 = vmul.f32 %v313_v60, %v308_v62 }
 0x309   :  { %v445_v1 = vpop.eup %444 }
 0x30a   :  { %v309_v2 = vmul.f32 %v445_v1, %v295_v50  ;;  %v320_v3 = vadd.f32 %v319_v63, %v314_v0 }
 0x30c   :  { %v315_v4 = vmul.f32 %v313_v60, %v309_v2  ;;  %322 = vst [vmem:[#allocation8] sm:$0xff] %v320_v3 }
 0x30e   :  { %v321_v5 = vadd.f32 %v319_v63, %v315_v4 }
 0x310   :  { %323 = vst [vmem:[#allocation8 + $0x8] sm:$0xff] %v321_v5 }
 0x311   :  { %517 = shalt.err (!%p514_p5)
}
 0x312   :  { %335 = dma.vmem_to_hbm [thread:$0]  %s330_s7, 256, %s592_s4, [#allocation4], %s536_s25, %s536_s25, %s537_s26  }
 0x313   :  { %530 = dma.done.wait [#allocation4], 256  }
 0x314   :  { %531 = vsyncadd [#allocation4], 4294967040 }
 0x315   :  { %339 = vsyncpa [#allocation3], 1 }
 0x316   :  { %340 = vsyncpa [#allocation6], 1 }
 0x317   :  { %341 = vsyncpa [#allocation4], 1 }

</bundles_post_ra>
